<compile_context>
chip_gen: v7x
topology: tpu7x:2x2x1
jax: 0.10.0
libtpu: 0.0.40
codegen_flags: <defaults>
</compile_context>

<pallas_src>
import jax
import jax.numpy as jnp
import numpy as np
from jax.experimental import pallas as pl
from jax.experimental.pallas import tpu as pltpu


def _mha_pool_kernel(x_ref, wv_ref, bv_ref, wkq_ref, rep_ref, wo_ref, bo_ref,
                     out_ref, w_ref):
    tb, seq, feat = x_ref.shape          # static block shape
    n_head = wkq_ref.shape[1]
    hf = n_head * feat

    x2d = x_ref[...].reshape(tb * seq, feat)                          # bf16 (TB*S, F)

    # v projection (bf16 MXU operands, f32 accumulation, f32 bias).
    v = jnp.dot(x2d, wv_ref[...], preferred_element_type=jnp.float32)
    v = v + bv_ref[...]                                               # (TB*S, H*F) f32

    # Folded (q_proj o k_proj) * scale projection -> per-head attention logits.
    qk = jnp.dot(x2d, wkq_ref[...], preferred_element_type=jnp.float32)
    qk3 = qk.reshape(tb, seq, n_head)                                 # (TB, S, H)

    # Softmax over the sequence axis, per batch element and head.
    m = jnp.max(qk3, axis=1, keepdims=True)
    e = jnp.exp(qk3 - m)
    denom = jnp.sum(e, axis=1, keepdims=True)
    p = e * pl.reciprocal(denom, approx=True)                         # (TB, S, H)
    w_ref[...] = p

    # Broadcast each head's weight across its F value lanes with an exact 0/1
    # matmul (rep[h, h*F:(h+1)*F] == 1), then multiply-reduce over the sequence
    # axis on the VPU/XLU — no redundant (H, H*F) MXU output, no lane slicing.
    p_rep = jnp.dot(p.reshape(tb * seq, n_head), rep_ref[...],
                    preferred_element_type=jnp.float32)               # (TB*S, H*F)
    pooled = jnp.sum((v * p_rep).reshape(tb, seq, hf), axis=1)        # (TB, H*F)

    # Output projection (tiny; kept in f32 to avoid re-rounding pooled).
    out = jnp.dot(pooled, wo_ref[...], preferred_element_type=jnp.float32)
    out_ref[...] = out + bo_ref[...]                                  # (TB, F)


def _choose_block_batch(B, S):
    """Pick how many batch elements to process per grid step."""
    # Target >= 256 matmul rows per step (v6e/v7x MXU contraction width) while
    # keeping per-step VMEM tiny (TB*S*F*2B double-buffered is well under the
    # default scoped VMEM even on v7x).
    tb = max(1, min(B, (256 + S - 1) // S))
    # v7x: prefer >= 2 grid steps on the 'parallel' axis (2 TensorCores) as long
    # as each step still feeds the MXU with >= 128 rows.
    if tb == B and B > 1 and (B // 2) * S >= 128:
        tb = (B + 1) // 2
    return tb


def multihead_attention_pool(x, params, n_head):
    """x: (B, S, F) float32.  Returns (out (B, F), w (B, H, 1, S)), matching the
    PyTorch module's forward."""
    B, S, F = x.shape
    H = n_head
    # NOTE: reproduces the module exactly: 1 / feat**(-0.5) == sqrt(feat).
    scale = 1.0 / F ** (-0.5)

    wq = params["wq"]                     # (1, F)
    # params["bq"] (scalar q_proj bias) shifts every logit uniformly; softmax is
    # shift-invariant, so it has no effect on either output and is dropped.
    wk = params["wk"]                     # (H*F, F)   k_proj (bias=False)
    wv, bv = params["wv"], params["bv"]   # (H*F, F), (H*F,)
    wo, bo = params["wo"], params["bo"]   # (F, H*F), (F,)

    # Fold k_proj and q_proj (and the scale) into a single (F, H) matrix:
    #   qk[b,s,h] = sum_d x[b,s,d] * sum_f wq[0,f] * wk[h*F+f, d]
    wk_heads = wk.reshape(H, F, F)                                   # (head, f_out, d_in)
    wkq = jnp.einsum("f,hfd->dh", wq[0], wk_heads) * scale           # (F, H) f32
    wkq_bf16 = wkq.astype(jnp.bfloat16)

    wv_t = wv.T.astype(jnp.bfloat16)                                 # (F, H*F) bf16
    bv_arr = bv.reshape(1, H * F).astype(jnp.float32)
    wo_t = wo.T.astype(jnp.float32)                                  # (H*F, F)
    bo_arr = bo.reshape(1, F).astype(jnp.float32)
    # 0/1 matrix that repeats each head's softmax weight across its F lanes.
    rep = jnp.repeat(jnp.eye(H, dtype=jnp.float32), F, axis=1)       # (H, H*F)

    x_bf16 = x.astype(jnp.bfloat16)

    TB = _choose_block_batch(B, S)
    n_steps = (B + TB - 1) // TB
    B_pad = n_steps * TB
    if B_pad != B:
        # Zero-padded rows give a uniform softmax (no NaNs) and are sliced off.
        x_bf16 = jnp.pad(x_bf16, ((0, B_pad - B), (0, 0), (0, 0)))

    out, w = pl.pallas_call(
        _mha_pool_kernel,
        out_shape=(
            jax.ShapeDtypeStruct((B_pad, F), jnp.float32),
            jax.ShapeDtypeStruct((B_pad, S, H), jnp.float32),
        ),
        grid_spec=pltpu.PrefetchScalarGridSpec(
            num_scalar_prefetch=0,
            grid=(n_steps,),
            in_specs=[
                pl.BlockSpec((TB, S, F), lambda b: (b, 0, 0)),   # x (bf16)
                pl.BlockSpec((F, H * F), lambda b: (0, 0)),      # wv^T (bf16)
                pl.BlockSpec((1, H * F), lambda b: (0, 0)),      # bv
                pl.BlockSpec((F, H), lambda b: (0, 0)),          # folded wk.wq*scale (bf16)
                pl.BlockSpec((H, H * F), lambda b: (0, 0)),      # head-repeat 0/1 matrix
                pl.BlockSpec((H * F, F), lambda b: (0, 0)),      # wo^T
                pl.BlockSpec((1, F), lambda b: (0, 0)),          # bo
            ],
            out_specs=[
                pl.BlockSpec((TB, F), lambda b: (b, 0)),
                pl.BlockSpec((TB, S, H), lambda b: (b, 0, 0)),
            ],
        ),
        compiler_params=pltpu.CompilerParams(
            dimension_semantics=("parallel",)),
    )(x_bf16, wv_t, bv_arr, wkq_bf16, rep, wo_t, bo_arr)

    out = out[:B]
    w = jnp.transpose(w[:B], (0, 2, 1))[:, :, None, :]   # (B, H, 1, S) as in torch
    return out, w


def reference(x, params, n_head):
    """Pure-JAX (f32) transcription of the PyTorch forward, for verification."""
    wq, bq, wk, wv, bv, wo, bo = (params["wq"], params["bq"], params["wk"],
                                  params["wv"], params["bv"], params["wo"],
                                  params["bo"])
    B, S, F = x.shape
    H = n_head
    scale = 1.0 / F ** (-0.5)
    k = x @ wk.T                                             # (B, S, H*F)
    k = k.reshape(B, S, H, F).transpose(0, 2, 1, 3)          # (B, H, S, F)
    v = (x @ wv.T + bv).reshape(B, S, H, F).transpose(0, 2, 1, 3)
    qk = (k @ wq.T + bq).transpose(0, 1, 3, 2) * scale       # (B, H, 1, S)
    w = jax.nn.softmax(qk, axis=-1)
    wvv = jnp.squeeze(w @ v, axis=2).reshape(B, H * F)
    out = wvv @ wo.T + bo
    return out, w


if __name__ == "__main__":
    n_head, n_dim = 4, 32
    B, S, F = 2, 8, n_dim

    key = jax.random.PRNGKey(0)
    ks = jax.random.split(key, 8)
    bound = 1.0 / np.sqrt(n_dim)
    bound_o = 1.0 / np.sqrt(n_dim * n_head)
    params = {
        "wq": jax.random.uniform(ks[0], (1, n_dim), jnp.float32, -bound, bound),
        "bq": jax.random.uniform(ks[1], (1,), jnp.float32, -bound, bound),
        "wk": jax.random.uniform(ks[2], (n_dim * n_head, n_dim), jnp.float32, -bound, bound),
        "wv": jax.random.uniform(ks[3], (n_dim * n_head, n_dim), jnp.float32, -bound, bound),
        "bv": jax.random.uniform(ks[4], (n_dim * n_head,), jnp.float32, -bound, bound),
        "wo": jax.random.uniform(ks[5], (n_dim, n_dim * n_head), jnp.float32, -bound_o, bound_o),
        "bo": jax.random.uniform(ks[6], (n_dim,), jnp.float32, -bound_o, bound_o),
    }
    x = jax.random.normal(ks[7], (B, S, F), jnp.float32)

    out, w = multihead_attention_pool(x, params, n_head)
    out, w = jax.block_until_ready((out, w))

    out_ref, w_ref = reference(x, params, n_head)
    # Tolerances account for bf16 MXU operands (f32 accumulation) and the
    # approximate reciprocal in the softmax normalization.
    np.testing.assert_allclose(np.asarray(out), np.asarray(out_ref), rtol=5e-2, atol=2e-2)
    np.testing.assert_allclose(np.asarray(w), np.asarray(w_ref), rtol=5e-2, atol=1e-2)

    print("KERNEL_OK")
</pallas_src>

<mosaic_0001>
module attributes {stable_mosaic.version = 11 : i64} {
  func.func @_mha_pool_kernel(%arg0: i32, %arg1: memref<2x8x32xbf16, #tpu.memory_space<vmem>>, %arg2: memref<32x128xbf16, #tpu.memory_space<vmem>>, %arg3: memref<1x128xf32, #tpu.memory_space<vmem>>, %arg4: memref<32x4xbf16, #tpu.memory_space<vmem>>, %arg5: memref<4x128xf32, #tpu.memory_space<vmem>>, %arg6: memref<128x32xf32, #tpu.memory_space<vmem>>, %arg7: memref<1x32xf32, #tpu.memory_space<vmem>>, %arg8: memref<2x32xf32, #tpu.memory_space<vmem>>, %arg9: memref<2x8x4xf32, #tpu.memory_space<vmem>>) attributes {dimension_semantics = [#tpu.dimension_semantics<parallel>], iteration_bounds = array<i64: 1>, scalar_prefetch = 0 : i64, scratch_operands = 0 : i64, tpu.core_type = #tpu.core_type<tc>, window_params = [{transform_indices = @transform_0, window_bounds = array<i64: 2, 8, 32>}, {pipeline_mode = #tpu.pipeline_mode<synchronous>, transform_indices = @transform_1, window_bounds = array<i64: 32, 128>}, {pipeline_mode = #tpu.pipeline_mode<synchronous>, transform_indices = @transform_2, window_bounds = array<i64: 1, 128>}, {pipeline_mode = #tpu.pipeline_mode<synchronous>, transform_indices = @transform_3, window_bounds = array<i64: 32, 4>}, {pipeline_mode = #tpu.pipeline_mode<synchronous>, transform_indices = @transform_4, window_bounds = array<i64: 4, 128>}, {pipeline_mode = #tpu.pipeline_mode<synchronous>, transform_indices = @transform_5, window_bounds = array<i64: 128, 32>}, {pipeline_mode = #tpu.pipeline_mode<synchronous>, transform_indices = @transform_6, window_bounds = array<i64: 1, 32>}, {transform_indices = @transform_7, window_bounds = array<i64: 2, 32>}, {transform_indices = @transform_8, window_bounds = array<i64: 2, 8, 4>}]} {
    %c0 = arith.constant 0 : index
    %c0_0 = arith.constant 0 : index
    %c0_1 = arith.constant 0 : index
    %0 = vector.load %arg1[%c0, %c0_0, %c0_1] : memref<2x8x32xbf16, #tpu.memory_space<vmem>>, vector<2x8x32xbf16>
    %1 = vector.shape_cast %0 : vector<2x8x32xbf16> to vector<16x32xbf16>
    %c0_2 = arith.constant 0 : index
    %c0_3 = arith.constant 0 : index
    %2 = vector.load %arg2[%c0_2, %c0_3] : memref<32x128xbf16, #tpu.memory_space<vmem>>, vector<32x128xbf16>
    %cst = arith.constant dense<0.000000e+00> : vector<16x128xf32>
    %3 = tpu.matmul %1, %2, %cst {dimension_numbers = #tpu.dot_dimension_numbers<[1], [0], [0], [1], [0, 0, 1, 1], [], []>} : vector<16x32xbf16>, vector<32x128xbf16>, vector<16x128xf32> -> vector<16x128xf32>
    %c0_4 = arith.constant 0 : index
    %c0_5 = arith.constant 0 : index
    %4 = vector.load %arg3[%c0_4, %c0_5] : memref<1x128xf32, #tpu.memory_space<vmem>>, vector<1x128xf32>
    %5 = vector.broadcast %4 : vector<1x128xf32> to vector<16x128xf32>
    %6 = arith.addf %3, %5 : vector<16x128xf32>
    %c0_6 = arith.constant 0 : index
    %c0_7 = arith.constant 0 : index
    %7 = vector.load %arg4[%c0_6, %c0_7] : memref<32x4xbf16, #tpu.memory_space<vmem>>, vector<32x4xbf16>
    %cst_8 = arith.constant dense<0.000000e+00> : vector<16x4xf32>
    %8 = tpu.matmul %1, %7, %cst_8 {dimension_numbers = #tpu.dot_dimension_numbers<[1], [0], [0], [1], [0, 0, 1, 1], [], []>} : vector<16x32xbf16>, vector<32x4xbf16>, vector<16x4xf32> -> vector<16x4xf32>
    %9 = vector.shape_cast %8 : vector<16x4xf32> to vector<2x8x4xf32>
    %cst_9 = arith.constant dense<0xFF800000> : vector<2x4xf32>
    %10 = vector.multi_reduction <maximumf>, %9, %cst_9 [1] : vector<2x8x4xf32> to vector<2x4xf32>
    %11 = vector.shape_cast %10 : vector<2x4xf32> to vector<2x1x4xf32>
    %12 = vector.broadcast %11 : vector<2x1x4xf32> to vector<2x8x4xf32>
    %13 = arith.subf %9, %12 : vector<2x8x4xf32>
    %14 = math.exp %13 : vector<2x8x4xf32>
    %cst_10 = arith.constant dense<0.000000e+00> : vector<2x4xf32>
    %15 = vector.multi_reduction <add>, %14, %cst_10 [1] : vector<2x8x4xf32> to vector<2x4xf32>
    %16 = vector.shape_cast %15 : vector<2x4xf32> to vector<2x1x4xf32>
    %17 = tpu.reciprocal %16 {approx = true} : vector<2x1x4xf32> -> vector<2x1x4xf32>
    %18 = vector.broadcast %17 : vector<2x1x4xf32> to vector<2x8x4xf32>
    %19 = arith.mulf %14, %18 : vector<2x8x4xf32>
    %c0_11 = arith.constant 0 : index
    %c0_12 = arith.constant 0 : index
    %c0_13 = arith.constant 0 : index
    %20 = vector.load %arg9[%c0_11, %c0_12, %c0_13] : memref<2x8x4xf32, #tpu.memory_space<vmem>>, vector<2x8x4xf32>
    tpu.vector_store %arg9[%c0_11, %c0_12, %c0_13], %19 {strides = array<i32>} : memref<2x8x4xf32, #tpu.memory_space<vmem>>, vector<2x8x4xf32>,
    %21 = vector.shape_cast %19 : vector<2x8x4xf32> to vector<16x4xf32>
    %c0_14 = arith.constant 0 : index
    %c0_15 = arith.constant 0 : index
    %22 = vector.load %arg5[%c0_14, %c0_15] : memref<4x128xf32, #tpu.memory_space<vmem>>, vector<4x128xf32>
    %cst_16 = arith.constant dense<0.000000e+00> : vector<16x128xf32>
    %23 = tpu.matmul %21, %22, %cst_16 {dimension_numbers = #tpu.dot_dimension_numbers<[1], [0], [0], [1], [0, 0, 1, 1], [], []>} : vector<16x4xf32>, vector<4x128xf32>, vector<16x128xf32> -> vector<16x128xf32>
    %24 = arith.mulf %6, %23 : vector<16x128xf32>
    %25 = vector.shape_cast %24 : vector<16x128xf32> to vector<2x8x128xf32>
    %cst_17 = arith.constant dense<0.000000e+00> : vector<2x128xf32>
    %26 = vector.multi_reduction <add>, %25, %cst_17 [1] : vector<2x8x128xf32> to vector<2x128xf32>
    %c0_18 = arith.constant 0 : index
    %c0_19 = arith.constant 0 : index
    %27 = vector.load %arg6[%c0_18, %c0_19] : memref<128x32xf32, #tpu.memory_space<vmem>>, vector<128x32xf32>
    %cst_20 = arith.constant dense<0.000000e+00> : vector<2x32xf32>
    %28 = tpu.matmul %26, %27, %cst_20 {dimension_numbers = #tpu.dot_dimension_numbers<[1], [0], [0], [1], [0, 0, 1, 1], [], []>} : vector<2x128xf32>, vector<128x32xf32>, vector<2x32xf32> -> vector<2x32xf32>
    %c0_21 = arith.constant 0 : index
    %c0_22 = arith.constant 0 : index
    %29 = vector.load %arg7[%c0_21, %c0_22] : memref<1x32xf32, #tpu.memory_space<vmem>>, vector<1x32xf32>
    %30 = vector.broadcast %29 : vector<1x32xf32> to vector<2x32xf32>
    %31 = arith.addf %28, %30 : vector<2x32xf32>
    %c0_23 = arith.constant 0 : index
    %c0_24 = arith.constant 0 : index
    %32 = vector.load %arg8[%c0_23, %c0_24] : memref<2x32xf32, #tpu.memory_space<vmem>>, vector<2x32xf32>
    tpu.vector_store %arg8[%c0_23, %c0_24], %31 {strides = array<i32>} : memref<2x32xf32, #tpu.memory_space<vmem>>, vector<2x32xf32>,
    return
  }
  func.func @transform_0(%arg0: i32) -> (i32, i32, i32) {
    %c0_i32 = arith.constant 0 : i32
    %c0_i32_0 = arith.constant 0 : i32
    %c0_i32_1 = arith.constant 0 : i32
    return %arg0, %c0_i32, %c0_i32_0 : i32, i32, i32
  }
  func.func @transform_1(%arg0: i32) -> (i32, i32) {
    %c0_i32 = arith.constant 0 : i32
    %c0_i32_0 = arith.constant 0 : i32
    %c0_i32_1 = arith.constant 0 : i32
    return %c0_i32, %c0_i32_0 : i32, i32
  }
  func.func @transform_2(%arg0: i32) -> (i32, i32) {
    %c0_i32 = arith.constant 0 : i32
    %c0_i32_0 = arith.constant 0 : i32
    %c0_i32_1 = arith.constant 0 : i32
    return %c0_i32, %c0_i32_0 : i32, i32
  }
  func.func @transform_3(%arg0: i32) -> (i32, i32) {
    %c0_i32 = arith.constant 0 : i32
    %c0_i32_0 = arith.constant 0 : i32
    %c0_i32_1 = arith.constant 0 : i32
    return %c0_i32, %c0_i32_0 : i32, i32
  }
  func.func @transform_4(%arg0: i32) -> (i32, i32) {
    %c0_i32 = arith.constant 0 : i32
    %c0_i32_0 = arith.constant 0 : i32
    %c0_i32_1 = arith.constant 0 : i32
    return %c0_i32, %c0_i32_0 : i32, i32
  }
  func.func @transform_5(%arg0: i32) -> (i32, i32) {
    %c0_i32 = arith.constant 0 : i32
    %c0_i32_0 = arith.constant 0 : i32
    %c0_i32_1 = arith.constant 0 : i32
    return %c0_i32, %c0_i32_0 : i32, i32
  }
  func.func @transform_6(%arg0: i32) -> (i32, i32) {
    %c0_i32 = arith.constant 0 : i32
    %c0_i32_0 = arith.constant 0 : i32
    %c0_i32_1 = arith.constant 0 : i32
    return %c0_i32, %c0_i32_0 : i32, i32
  }
  func.func @transform_7(%arg0: i32) -> (i32, i32) {
    %c0_i32 = arith.constant 0 : i32
    %c0_i32_0 = arith.constant 0 : i32
    return %arg0, %c0_i32 : i32, i32
  }
  func.func @transform_8(%arg0: i32) -> (i32, i32, i32) {
    %c0_i32 = arith.constant 0 : i32
    %c0_i32_0 = arith.constant 0 : i32
    %c0_i32_1 = arith.constant 0 : i32
    return %arg0, %c0_i32, %c0_i32_0 : i32, i32, i32
  }
}

</mosaic_0001>

<bundles_post_ra>
// kernel: tpu_custom_call.1
= control target key start
LH: loop header
LB: loop body
LE: loop exit
PB: predicated region body
PF: predicated region fallthrough
CT: control target
= control target key end

     0   :  { %v580_v1 = vmov 0.0   ;;  %vm581_vm0 = vmmov 0   ;;  %s741_s0 = inlined_call_operand.vmem [shape: bf16[2,8,32], index: 0, kind: input, shape index: {}]   ;;  %s742_s1 = inlined_call_operand.vmem [shape: bf16[32,128], index: 1, kind: input, shape index: {}]   ;;  %s743_s2 = inlined_call_operand.vmem [shape: f32[1,128], index: 2, kind: input, shape index: {}]   ;;  %s744_s3 = inlined_call_operand.vmem [shape: bf16[32,4], index: 3, kind: input, shape index: {}]   ;;  %s745_s4 = inlined_call_operand.vmem [shape: f32[4,128], index: 4, kind: input, shape index: {}]   ;;  %s746_s5 = inlined_call_operand.vmem [shape: f32[128,32], index: 5, kind: input, shape index: {}]   ;;  %s747_s6 = inlined_call_operand.vmem [shape: f32[1,32], index: 6, kind: input, shape index: {}]   ;;  %s748_s7 = inlined_call_operand.hbm [shape: f32[2,32], index: 7, kind: output, shape index: {0}]   ;;  %s749_s8 = inlined_call_operand.vmem [shape: f32[2,8,4], index: 8, kind: output, shape index: {1}]  }
   0x1   :  { %v543_v0 = vld [vmem:[%s742_s1] sm:$0xff]   ;;  %459 = vmatprep.subr.bf16.mxu0 %v580_v1  ;;  %v544_v2 = vld [vmem:[%s742_s1 + $0x8] sm:$0xff]   ;;  %463 = vmatprep.mubr.msk.bf16.mxu0 %vm581_vm0, %v580_v1 }
   0x2   :  { %460 = vmatpush3.bf16.msra.mxu0 %v543_v0  ;;  %512 = vmatprep.mubr.msk.f32.mxu1 %vm581_vm0, %v580_v1  ;;  %v545_v3 = vld [vmem:[%s741_s0] sm:$0xff]  }
   0x3   :  { %461 = vmatprep.subr.bf16.mxu0 %v580_v1 }
   0x4   :  { %14 = vsyncpa [#allocation3], 0  ;;  %vm60_vm1 = vcmask 261120   ;;  %v546_v4 = vld [vmem:[%s744_s3] sm:$0xff]   ;;  %v547_v5 = vld [vmem:[%s744_s3 + $0x8] sm:$0xff]   ;;  %vm210_vm2 = vcmask 1043456  }
   0x5   :  { %v203_v6 = vld [vmem:[%s745_s4] sm:$0xf]  ;;  %v304_v8 = vld [vmem:[%s746_s5 + $0x8] sm:$0xff]  ;;  %v305_v9 = vld [vmem:[%s746_s5 + $0x10] sm:$0xff]  ;;  %v582_v10 = vmov 0.0|0.0   ;;  %vm162_vm3 = vcmask 31744  }
   0x6   :  { %462 = vmatpush3.bf16.msra.mxu0 %v544_v2  ;;  %v303_v7 = vld [vmem:[%s746_s5] sm:$0xff]  ;;  %515 = vmatprep.subr.bf16.mxu1 %v582_v10  ;;  %v306_v12 = vld [vmem:[%s746_s5 + $0x18] sm:$0xff]  ;;  %v308_v15 = vld [vmem:[%s746_s5 + $0x28] sm:$0xff]  ;;  %vm328_vm4 = vcmask 1041409   ;;  %s583_s24 = smov [#allocation2]   ;;  %vm401_vm5 = vcmask 254976  }
   0x7   :  { %467 = vmatprep.subr.bf16.mxu0 %v580_v1  ;;  %v516_v11 = vpack.c.bf16 %v304_v8, %v303_v7  ;;  %v519_v13 = vpack.c.bf16 %v306_v12, %v305_v9  ;;  %v307_v14 = vld [vmem:[%s746_s5 + $0x20] sm:$0xff]  ;;  %v309_v17 = vld [vmem:[%s746_s5 + $0x30] sm:$0xff]  ;;  %v310_v18 = vld [vmem:[%s746_s5 + $0x38] sm:$0xff]  ;;  %s409_s25 = sshll.u32 %s583_s24, 4  ;;  %s410_s25 = int_to_ptr.vmem [resolvable:$true] %s409_s25 }
   0x8   :  { %v522_v16 = vpack.c.bf16 %v308_v15, %v307_v14  ;;  %v525_v19 = vpack.c.bf16 %v310_v18, %v309_v17  ;;  %v311_v2 = vld [vmem:[%s746_s5 + $0x40] sm:$0xff]  ;;  %v316_v9 = vld [vmem:[%s746_s5 + $0x68] sm:$0xff]  ;;  %v317_v12 = vld [vmem:[%s746_s5 + $0x70] sm:$0xff]  ;;  %s556_s26 = scalar_lea.vmem %s410_s25, 32  ;;  %p561_p1 = scmp.lt.s32.totalorder %s410_s25, %s410_s25 }
   0x9   :  { %464 = vmatmul.mubr.msk.bf16.vlgmr.msra.gmra.mrb[0].mxu0 %vm60_vm1, %v545_v3  ;;  %517 = vmatpush3.bf16.msra.mxu1 %v516_v11  ;;  %v315_v8 = vld [vmem:[%s746_s5 + $0x60] sm:$0xff]  ;;  %p557_p0 = scmp.ne.s32.totalorder %s410_s25, %s556_s26  ;;  %p562_p2 = scmp.lt.s32.totalorder %s556_s26, %s556_s26 }
   0xa   :  { %468 = vmatpush3.bf16.msra.mxu0 %v546_v4  ;;  %471 = vmatprep.mubr.msk.bf16.mxu0 %vm581_vm0, %v580_v1  ;;  %v534_v11 = vpack.c.bf16 %v316_v9, %v315_v8  ;;  %v421_v15 = vld [vmem:[%s743_s2] ss:$0 sm:$0xff] }
   0xb   :  { %469 = vmatprep.subr.bf16.mxu0 %v580_v1  ;;  %518 = vmatprep.subr.bf16.mxu1 %v582_v10  ;;  %p563_p3 = por %p562_p2, %p561_p1 }
   0xd   :  { %520 = vmatpush3.bf16.msra.mxu1 %v519_v13  ;;  %v318_v13 = vld [vmem:[%s746_s5 + $0x78] sm:$0xff]  ;;  %p564_p4 = pnand %p563_p3, %p557_p0 }
   0xe   :  { %470 = vmatpush3.bf16.msra.mxu0 %v547_v5  ;;  %521 = vmatprep.subr.bf16.mxu1 %v582_v10  ;;  %v313_v5 = vld [vmem:[%s746_s5 + $0x50] sm:$0xff]  ;;  %v537_v14 = vpack.c.bf16 %v318_v13, %v317_v12 }
   0xf   :  { %475 = vmatprep.subr.msk.mxu0 %vm210_vm2, %v203_v6 }
  0x11   :  { %472 = vmatmul.mubr.msk.bf16.vlgmr.msra.gmra.mrb[4].mxu0 %vm60_vm1, %v545_v3  ;;  %523 = vmatpush3.bf16.msra.mxu1 %v522_v16  ;;  %v312_v3 = vld [vmem:[%s746_s5 + $0x48] sm:$0xff] }
  0x12   :  { %476 = vmatpush3.msk.msra.mxu0 %vm210_vm2, %v203_v6  ;;  %524 = vmatprep.subr.bf16.mxu1 %v582_v10  ;;  %v528_v4 = vpack.c.bf16 %v312_v3, %v311_v2  ;;  %v314_v6 = vld [vmem:[%s746_s5 + $0x58] sm:$0xff] }
  0x13   :  { %v531_v7 = vpack.c.bf16 %v314_v6, %v313_v5 }
  0x15   :  { %526 = vmatpush3.bf16.msra.mxu1 %v525_v19 }
  0x16   :  { %527 = vmatprep.subr.bf16.mxu1 %v582_v10 }
  0x19   :  { %529 = vmatpush3.bf16.msra.mxu1 %v528_v4 }
  0x1a   :  { %530 = vmatprep.subr.bf16.mxu1 %v582_v10 }
  0x1d   :  { %532 = vmatpush3.bf16.msra.mxu1 %v531_v7 }
  0x1e   :  { %533 = vmatprep.subr.bf16.mxu1 %v582_v10 }
  0x21   :  { %535 = vmatpush3.bf16.msra.mxu1 %v534_v11 }
  0x22   :  { %536 = vmatprep.subr.bf16.mxu1 %v582_v10 }
  0x25   :  { %538 = vmatpush3.bf16.msra.mxu1 %v537_v14 }
  0xdc   :  { %v676_v20 = vpop.f32.mrb[0].mxu0 }
  0xdd   :  { %v465_v21 = vpop.f32.mrb[1].mxu0  ;;  %v99_v17 = vadd.f32 %v421_v15, %v676_v20  ;;  %v432_v20 = vld [vmem:[%s747_s6] ss:$0 sm:$0xff] }
  0xde   :  { %v678_v22 = vpop.f32.mrb[2].mxu0 }
  0xdf   :  { %v466_v23 = vpop.f32.mrb[3].mxu0  ;;  %v102_v16 = vadd.f32 %v421_v15, %v678_v22 }
  0xe4   :  { %v155_v24 = vpop.f32.mrb[4].mxu0 }
  0xe5   :  { %v163_v25 = vsel %vm162_vm3, %v155_v24, -inf  ;;  %v473_v26 = vpop.f32.mrb[5].mxu0 }
  0xe6   :  { %v164_v27 = vrot.slane %v163_v25, 4  ;;  %v158_v28 = vpop.f32.mrb[6].mxu0 }
  0xe7   :  { %v170_v29 = vsel %vm162_vm3, %v158_v28, -inf  ;;  %v474_v30 = vpop.f32.mrb[7].mxu0 }
  0xe8   :  { %v165_v31 = vmax.f32 %v163_v25, %v164_v27  ;;  %v171_v32 = vrot.slane %v170_v29, 4 }
  0xea   :  { %v166_v33 = vrot.slane %v165_v31, 2  ;;  %v172_v34 = vmax.f32 %v170_v29, %v171_v32 }
  0xec   :  { %v167_v35 = vmax.f32 %v165_v31, %v166_v33  ;;  %v173_v36 = vrot.slane %v172_v34, 2 }
  0xee   :  { %v168_v37 = vrot.slane %v167_v35, 1  ;;  %v174_v38 = vmax.f32 %v172_v34, %v173_v36 }
  0xf0   :  { %v169_v39 = vmax.f32 %v167_v35, %v168_v37  ;;  %v175_v40 = vrot.slane %v174_v38, 1 }
  0xf2   :  { %v177_v41 = vsub.f32 %v155_v24, %v169_v39  ;;  %v176_v42 = vmax.f32 %v174_v38, %v175_v40 }
  0xf4   :  { %v179_v43 = vmul.f32 1.442695, %v177_v41  ;;  %v178_v44 = vsub.f32 %v158_v28, %v176_v42 }
  0xf6   :  { %548 = vpow2.f32 %v179_v43  ;;  %v181_v45 = vmul.f32 1.442695, %v178_v44 }
  0xf8   :  { %550 = vpow2.f32 %v181_v45 }
 0x100   :  { %v549_v46 = vpop.eup %548 }
 0x101   :  { %v183_v47 = vsel %vm162_vm3, %v549_v46, 0.0 }
 0x102   :  { %v551_v48 = vpop.eup %550  ;;  %v184_v49 = vrot.slane %v183_v47, 4 }
 0x103   :  { %v190_v50 = vsel %vm162_vm3, %v551_v48, 0.0 }
 0x104   :  { %v185_v51 = vadd.f32 %v184_v49, %v183_v47  ;;  %v191_v52 = vrot.slane %v190_v50, 4 }
 0x106   :  { %v186_v53 = vrot.slane %v185_v51, 2  ;;  %v192_v54 = vadd.f32 %v191_v52, %v190_v50 }
 0x108   :  { %v187_v55 = vadd.f32 %v186_v53, %v185_v51  ;;  %v193_v56 = vrot.slane %v192_v54, 2 }
 0x10a   :  { %v188_v57 = vrot.slane %v187_v55, 1  ;;  %v194_v58 = vadd.f32 %v193_v56, %v192_v54 }
 0x10c   :  { %v189_v59 = vadd.f32 %v188_v57, %v187_v55  ;;  %v195_v60 = vrot.slane %v194_v58, 1 }
 0x10e   :  { %v196_v61 = vadd.f32 %v195_v60, %v194_v58  ;;  %552 = vrcp.f32 %v189_v59 }
 0x110   :  { %554 = vrcp.f32 %v196_v61 }
 0x118   :  { %v553_v62 = vpop.eup %552 }
 0x119   :  { %v199_v63 = vmul.f32 %v553_v62, %v549_v46 }
 0x11a   :  { %v555_v0 = vpop.eup %554 }
 0x11b   :  { %201 = vst.msk [vmem:[%s749_s8] sm:$0xff] %vm162_vm3, %v199_v63  ;;  %477 = vmatprep.mubr.msk.f32.mxu0 %vm162_vm3, %v199_v63  ;;  %v200_v1 = vmul.f32 %v555_v0, %v551_v48 }
 0x11d   :  { %202 = vst.msk [vmem:[%s749_s8 + $0x8] sm:$0xff] %vm162_vm3, %v200_v1  ;;  %478 = vmatmul.mubr.msk.f32.vlgmr.msra.gmra.mrb[8].mxu0 %vm162_vm3, %v200_v1 }
 0x1f0   :  { %v479_v18 = vpop.f32.mrb[8].mxu0 }
 0x1f1   :  { %v290_v10 = vmul.f32 %v479_v18, %v102_v16  ;;  %v280_v19 = vpop.f32.mrb[9].mxu0 }
 0x1f2   :  { %v289_v21 = vmul.f32 %v280_v19, %v99_v17 }
 0x1f3   :  { %v297_v23 = vrot.slane %v290_v10, 4 }
 0x1f4   :  { %v291_v24 = vrot.slane %v289_v21, 4 }
 0x1f5   :  { %v298_v25 = vadd.f32 %v297_v23, %v290_v10 }
 0x1f6   :  { %v292_v26 = vadd.f32 %v291_v24, %v289_v21 }
 0x1f7   :  { %v299_v27 = vrot.slane %v298_v25, 2 }
 0x1f8   :  { %v293_v28 = vrot.slane %v292_v26, 2 }
 0x1f9   :  { %v300_v29 = vadd.f32 %v299_v27, %v298_v25 }
 0x1fa   :  { %v294_v30 = vadd.f32 %v293_v28, %v292_v26 }
 0x1fb   :  { %v301_v31 = vrot.slane %v300_v29, 1 }
 0x1fc   :  { %v295_v32 = vrot.slane %v294_v30, 1 }
 0x1fd   :  { %v302_v33 = vadd.f32 %v301_v31, %v300_v29 }
 0x1fe   :  { %v296_v34 = vadd.f32 %v295_v32, %v294_v30 }
 0x200   :  { %v329_v22 = vsel %vm328_vm4, %v302_v33, %v296_v34 }
 0x201   :  { %513 = vmatmul.mubr.f32.vlgmr.msra.gmra.mrb[0].mxu1 %v329_v22 }
 0x2d4   :  { %v397_v35 = vpop.f32.mrb[0].mxu1 }
 0x2d5   :  { %v398_v36 = vadd.f32 %v432_v20, %v397_v35  ;;  %v514_v37 = vpop.f32.mrb[1].mxu1 }
 0x2d7   :  { %402 = vst.msk [vmem:[#allocation2] sm:$0x3] %vm401_vm5, %v398_v36 }
 0x2d8   :  { %567 = shalt.err (!%p564_p4)
}
 0x2d9   :  { %s568_s29 = scalar_lea.hbm %s748_s7, 32 }
 0x2da   :  { %p569_p5 = scmp.ne.s32.totalorder %s748_s7, %s568_s29  ;;  %p572_p6 = scmp.lt.u32.totalorder %s568_s29, %s748_s7 }
 0x2dc   :  { %p574_p7 = pnand %p572_p6, %p569_p5 }
 0x2de   :  { %577 = shalt.err (!%p574_p7)
}
 0x2df   :  { %412 = dma.vmem_to_hbm [thread:$0]  %s410_s25, 32, %s748_s7, [#allocation3]  }
 0x2e0   :  { %578 = dma.done.wait [#allocation3], 32  }
 0x2e1   :  { %579 = vsyncadd [#allocation3], 4294967264 }
 0x2e2   :  { %420 = vsyncpa [#allocation3], 1 }

</bundles_post_ra>
